<compile_context>
chip_gen: v7x
topology: tpu7x:2x2x1
jax: 0.10.0
libtpu: 0.0.40
codegen_flags: <defaults>
</compile_context>

<pallas_src>
import jax
import jax.numpy as jnp
from jax.experimental import pallas as pl
from jax.experimental.pallas import tpu as pltpu


def _mha_kernel(q_ref, kT_ref, v_ref, mask_ref, u_ref, m_ref,
                fcb_ref, gamma_ref, beta_ref, out_ref, attn_ref):
    len_q, d_model = q_ref.shape[1], q_ref.shape[2]
    len_k = kT_ref.shape[2]
    n_head = u_ref.shape[0]

    resid = q_ref[0]                        # (len_q, d_model) f32 — residual path
    maskb = mask_ref[0] > 0.0               # (len_q, len_k), 1.0 == masked

    # bf16 MXU operands, f32 accumulation (U_T / M_cat already stored bf16).
    kT = kT_ref[0].astype(jnp.bfloat16)     # (d_model, len_k)
    v2 = v_ref[0].astype(jnp.bfloat16)      # (len_k, d_model)

    # Key-side additive-map scores for ALL heads, lane-dense over len_k.
    # U_T[h] = Wk_h @ wmk was fused in the wrapper.          -> (n_head, len_k)
    sk = jnp.dot(u_ref[...], kT, preferred_element_type=jnp.float32)

    # Fused V-projection + fc output projection for ALL heads in ONE wide MXU
    # call: M_cat[:, h*dm:(h+1)*dm] = Wv_h @ fcw_h.          -> (len_k, n_head*d_model)
    vm = jnp.dot(v2, m_ref[...], preferred_element_type=jnp.float32)
    vm_b16 = vm.astype(jnp.bfloat16)

    inv_lk = jnp.float32(1.0 / len_k)
    y = jnp.zeros((len_q, d_model), jnp.float32)
    for h in range(n_head):                 # static unroll; n_head is small
        # Query-side score dropped (softmax shift-invariance): it only adds a
        # per-row constant.  exp hoisted out of the query dim: one EUP pass
        # over len_k per head.
        row = sk[h:h + 1, :]                                # (1, len_k)
        e_row = jnp.exp(row - jnp.max(row))                 # (1, len_k)
        e = jnp.where(maskb, 0.0, e_row)                    # (len_q, len_k)
        s = jnp.sum(e, axis=-1, keepdims=True)              # (len_q, 1)
        # Fully-masked-row guard: reference softmax gives the uniform dist.
        attn = jnp.where(s > 0.0, e * pl.reciprocal(s, approx=True), inv_lk)
        attn_ref[h, 0] = attn               # PyTorch head-major layout, f32
        # attn @ (v @ Wv_h @ fcw_h): accumulates fc(concat(heads)) directly.
        y = y + jnp.dot(attn.astype(jnp.bfloat16),
                        vm_b16[:, h * d_model:(h + 1) * d_model],
                        preferred_element_type=jnp.float32)

    # fc bias + LeakyReLU(0.2)
    y = y + fcb_ref[...]
    y = jnp.where(y >= 0, y, 0.2 * y)
    # TODO(synk): dropout omitted (eval-mode identity; stochastic op has no deterministic equivalent)

    # residual + LayerNorm (biased variance, eps=1e-5, matching torch.nn.LayerNorm)
    y = y + resid
    mean = jnp.mean(y, axis=-1, keepdims=True)
    var = jnp.mean((y - mean) ** 2, axis=-1, keepdims=True)
    out_ref[0] = (y - mean) * jax.lax.rsqrt(var + 1e-5) * gamma_ref[...] + beta_ref[...]


def _fuse_weights(Wk, Wv, wmk, fcw, *, n_head, d_k, d_v):
    """One-time weight prep (constant-folds under jit). Fused in f32, stored bf16."""
    # U_T[h] = Wk_h @ wmk : key projection folded into the additive map score.
    U_T = jnp.stack([(Wk[:, h * d_k:(h + 1) * d_k] @ wmk)[:, 0]
                     for h in range(n_head)], axis=0)                 # (n_head, d_model)
    # M_cat = [Wv_h @ fcw_h]_h concatenated along the output (lane) dim so the
    # kernel does ONE wide MXU matmul instead of n_head narrow ones.
    M_cat = jnp.concatenate([Wv[:, h * d_v:(h + 1) * d_v] @ fcw[h * d_v:(h + 1) * d_v, :]
                             for h in range(n_head)], axis=1)          # (d_model, n_head*d_model)
    return U_T.astype(jnp.bfloat16), M_cat.astype(jnp.bfloat16)


def map_based_mha(q, k, v, mask, params, *, n_head, d_k, d_v):
    (Wq, Wk, Wv, wmq, wmk, fcw, fcb, gamma, beta) = params
    # Wq / wmq are dead under the softmax shift-invariance optimization: the
    # query-side score is a per-row constant and cannot change the softmax.
    del Wq, wmq

    sz_b, len_q, d_model = q.shape
    len_k = k.shape[1]
    U_T, M_cat = _fuse_weights(Wk, Wv, wmk, fcw, n_head=n_head, d_k=d_k, d_v=d_v)

    # K pre-transposed so the in-kernel key-score matmul is lane-dense over
    # len_k (no XLU transpose, no narrow masked stores).
    kT = jnp.transpose(k, (0, 2, 1))

    # Whole-array VMEM residency for the constants (single-buffered): a blocked
    # constant index_map would make the pipeline double-buffer them.
    vmem_const = pl.BlockSpec(memory_space=pltpu.MemorySpace.VMEM)

    out, attn = pl.pallas_call(
        _mha_kernel,
        out_shape=(
            jax.ShapeDtypeStruct((sz_b, len_q, d_model), jnp.float32),
            jax.ShapeDtypeStruct((n_head, sz_b, len_q, len_k), jnp.float32),
        ),
        # Batch-pipelined grid: q/kT/v/mask DMA overlaps compute, and both
        # TensorCores get work on 2-TC chips.  (At production sizes add a len_q
        # grid axis so the attn block stays inside v7x's scoped VMEM.)
        grid=(sz_b,),
        in_specs=[
            pl.BlockSpec((1, len_q, d_model), lambda i: (i, 0, 0)),   # q (residual only)
            pl.BlockSpec((1, d_model, len_k), lambda i: (i, 0, 0)),   # k^T
            pl.BlockSpec((1, len_k, d_model), lambda i: (i, 0, 0)),   # v
            pl.BlockSpec((1, len_q, len_k), lambda i: (i, 0, 0)),     # mask (1.0 == masked)
            vmem_const,   # U_T   (n_head, d_model)          bf16
            vmem_const,   # M_cat (d_model, n_head*d_model)  bf16
            vmem_const,   # fc bias
            vmem_const,   # layernorm gamma
            vmem_const,   # layernorm beta
        ],
        out_specs=(
            pl.BlockSpec((1, len_q, d_model), lambda i: (i, 0, 0)),
            pl.BlockSpec((n_head, 1, len_q, len_k), lambda i: (0, i, 0, 0)),
        ),
        compiler_params=pltpu.CompilerParams(
            dimension_semantics=("parallel",),
            vmem_limit_bytes=32 * 1024 * 1024,
        ),
    )(q, kT, v, mask, U_T, M_cat, fcb, gamma, beta)

    # attn already head-major (PyTorch layout); merging leading dims is free.
    return out, attn.reshape(n_head * sz_b, len_q, len_k)


def _ref_forward(q, k, v, mask, Wq, Wk, Wv, wmq, wmk, fcw, fcb, gamma, beta,
                 *, n_head, d_k, d_v):
    """Pure-JAX reference mirroring the PyTorch forward (eval mode, unfused, f32)."""
    sz_b, len_q, d_model = q.shape
    len_k = k.shape[1]
    qp = (q @ Wq).reshape(sz_b, len_q, n_head, d_k)
    kp = (k @ Wk).reshape(sz_b, len_k, n_head, d_k)
    vp = (v @ Wv).reshape(sz_b, len_k, n_head, d_v)
    qh = qp.transpose(2, 0, 1, 3).reshape(n_head * sz_b, len_q, d_k)
    kh = kp.transpose(2, 0, 1, 3).reshape(n_head * sz_b, len_k, d_k)
    vh = vp.transpose(2, 0, 1, 3).reshape(n_head * sz_b, len_k, d_v)
    sq = qh @ wmq                                  # (HB, len_q, 1)
    sk = kh @ wmk                                  # (HB, len_k, 1)
    logits = sq + sk.transpose(0, 2, 1)            # (HB, len_q, len_k)
    mrep = jnp.tile(mask, (n_head, 1, 1))
    logits = jnp.where(mrep > 0, -1e10, logits)
    attn = jax.nn.softmax(logits, axis=2)
    out = attn @ vh
    out = out.reshape(n_head, sz_b, len_q, d_v).transpose(1, 2, 0, 3)
    out = out.reshape(sz_b, len_q, n_head * d_v)
    y = out @ fcw + fcb
    y = jnp.where(y >= 0, y, 0.2 * y)
    y = y + q
    mean = y.mean(-1, keepdims=True)
    var = ((y - mean) ** 2).mean(-1, keepdims=True)
    y = (y - mean) / jnp.sqrt(var + 1e-5) * gamma + beta
    return y, attn


if __name__ == "__main__":
    # Small shapes consistent with the module's forward.
    sz_b, seq, d_model = 2, 8, 32
    n_head, d_k, d_v = 2, 16, 16

    key = jax.random.PRNGKey(0)
    ks = jax.random.split(key, 10)

    # Inputs
    q = jax.random.normal(ks[0], (sz_b, seq, d_model), jnp.float32)
    k = jax.random.normal(ks[1], (sz_b, seq, d_model), jnp.float32)
    v = jax.random.normal(ks[2], (sz_b, seq, d_model), jnp.float32)
    # Padding-style mask: 1.0 means masked out (like torch masked_fill(mask, -1e10)).
    valid = jnp.array([6, 5])
    mask = (jnp.arange(seq)[None, None, :] >= valid[:, None, None]).astype(jnp.float32)
    mask = jnp.broadcast_to(mask, (sz_b, seq, seq))

    # Parameters (deterministic init; weights stored as (in, out) for x @ W).
    Wq = 0.1 * jax.random.normal(ks[3], (d_model, n_head * d_k), jnp.float32)
    Wk = 0.1 * jax.random.normal(ks[4], (d_model, n_head * d_k), jnp.float32)
    Wv = 0.1 * jax.random.normal(ks[5], (d_model, n_head * d_v), jnp.float32)
    w_map = 0.1 * jax.random.normal(ks[6], (2 * d_k, 1), jnp.float32)
    wmq, wmk = w_map[:d_k], w_map[d_k:]
    fc_std = (2.0 / (n_head * d_v + d_model)) ** 0.5   # xavier_normal_
    fcw = fc_std * jax.random.normal(ks[7], (n_head * d_v, d_model), jnp.float32)
    fcb = 0.01 * jax.random.normal(ks[8], (1, d_model), jnp.float32)
    gamma = jnp.ones((1, d_model), jnp.float32)
    beta = jnp.zeros((1, d_model), jnp.float32)

    params = (Wq, Wk, Wv, wmq, wmk, fcw, fcb, gamma, beta)

    out, attn = map_based_mha(q, k, v, mask, params, n_head=n_head, d_k=d_k, d_v=d_v)
    out = jax.block_until_ready(out)
    attn = jax.block_until_ready(attn)

    # Verify against a pure-JAX reference of the PyTorch forward.
    # attn: computed/stored in f32 (bf16 only feeds the score matmul) -> 2e-3.
    # out:  bf16 MXU operands on the v/fc path + approx reciprocal -> 5e-3.
    ref_out, ref_attn = _ref_forward(q, k, v, mask, *params,
                                     n_head=n_head, d_k=d_k, d_v=d_v)
    assert out.shape == (sz_b, seq, d_model)
    assert attn.shape == (n_head * sz_b, seq, seq)
    assert jnp.allclose(attn, ref_attn, rtol=2e-3, atol=2e-3)
    assert jnp.allclose(out, ref_out, rtol=5e-3, atol=5e-3)

    print("KERNEL_OK")
</pallas_src>

<mosaic_0001>
module attributes {stable_mosaic.version = 11 : i64} {
  func.func @_mha_kernel(%arg0: i32, %arg1: memref<1x8x32xf32, #tpu.memory_space<vmem>>, %arg2: memref<1x32x8xf32, #tpu.memory_space<vmem>>, %arg3: memref<1x8x32xf32, #tpu.memory_space<vmem>>, %arg4: memref<1x8x8xf32, #tpu.memory_space<vmem>>, %arg5: memref<2x32xbf16, #tpu.memory_space<vmem>>, %arg6: memref<32x64xbf16, #tpu.memory_space<vmem>>, %arg7: memref<1x32xf32, #tpu.memory_space<vmem>>, %arg8: memref<1x32xf32, #tpu.memory_space<vmem>>, %arg9: memref<1x32xf32, #tpu.memory_space<vmem>>, %arg10: memref<1x8x32xf32, #tpu.memory_space<vmem>>, %arg11: memref<2x1x8x8xf32, #tpu.memory_space<vmem>>) attributes {dimension_semantics = [#tpu.dimension_semantics<parallel>], iteration_bounds = array<i64: 2>, scalar_prefetch = 0 : i64, scratch_operands = 0 : i64, tpu.core_type = #tpu.core_type<tc>, window_params = [{transform_indices = @transform_0, window_bounds = array<i64: 1, 8, 32>}, {transform_indices = @transform_1, window_bounds = array<i64: 1, 32, 8>}, {transform_indices = @transform_2, window_bounds = array<i64: 1, 8, 32>}, {transform_indices = @transform_3, window_bounds = array<i64: 1, 8, 8>}, {pipeline_mode = #tpu.pipeline_mode<synchronous>, transform_indices = @transform_4, window_bounds = array<i64: 2, 32>}, {pipeline_mode = #tpu.pipeline_mode<synchronous>, transform_indices = @transform_5, window_bounds = array<i64: 32, 64>}, {pipeline_mode = #tpu.pipeline_mode<synchronous>, transform_indices = @transform_6, window_bounds = array<i64: 1, 32>}, {pipeline_mode = #tpu.pipeline_mode<synchronous>, transform_indices = @transform_7, window_bounds = array<i64: 1, 32>}, {pipeline_mode = #tpu.pipeline_mode<synchronous>, transform_indices = @transform_8, window_bounds = array<i64: 1, 32>}, {transform_indices = @transform_9, window_bounds = array<i64: 1, 8, 32>}, {transform_indices = @transform_10, window_bounds = array<i64: 2, 1, 8, 8>}]} {
    %c0 = arith.constant 0 : index
    %c0_0 = arith.constant 0 : index
    %c0_1 = arith.constant 0 : index
    %0 = vector.load %arg1[%c0, %c0_0, %c0_1] : memref<1x8x32xf32, #tpu.memory_space<vmem>>, vector<1x8x32xf32>
    %1 = vector.shape_cast %0 : vector<1x8x32xf32> to vector<8x32xf32>
    %c0_2 = arith.constant 0 : index
    %c0_3 = arith.constant 0 : index
    %c0_4 = arith.constant 0 : index
    %2 = vector.load %arg4[%c0_2, %c0_3, %c0_4] : memref<1x8x8xf32, #tpu.memory_space<vmem>>, vector<1x8x8xf32>
    %3 = vector.shape_cast %2 : vector<1x8x8xf32> to vector<8x8xf32>
    %cst = arith.constant 0.000000e+00 : f32
    %4 = vector.broadcast %cst : f32 to vector<8x8xf32>
    %5 = arith.cmpf ogt, %3, %4 : vector<8x8xf32>
    %c0_5 = arith.constant 0 : index
    %c0_6 = arith.constant 0 : index
    %c0_7 = arith.constant 0 : index
    %6 = vector.load %arg2[%c0_5, %c0_6, %c0_7] : memref<1x32x8xf32, #tpu.memory_space<vmem>>, vector<1x32x8xf32>
    %7 = vector.shape_cast %6 : vector<1x32x8xf32> to vector<32x8xf32>
    %8 = arith.truncf %7 : vector<32x8xf32> to vector<32x8xbf16>
    %c0_8 = arith.constant 0 : index
    %c0_9 = arith.constant 0 : index
    %c0_10 = arith.constant 0 : index
    %9 = vector.load %arg3[%c0_8, %c0_9, %c0_10] : memref<1x8x32xf32, #tpu.memory_space<vmem>>, vector<1x8x32xf32>
    %10 = vector.shape_cast %9 : vector<1x8x32xf32> to vector<8x32xf32>
    %11 = arith.truncf %10 : vector<8x32xf32> to vector<8x32xbf16>
    %c0_11 = arith.constant 0 : index
    %c0_12 = arith.constant 0 : index
    %12 = vector.load %arg5[%c0_11, %c0_12] : memref<2x32xbf16, #tpu.memory_space<vmem>>, vector<2x32xbf16>
    %cst_13 = arith.constant dense<0.000000e+00> : vector<2x8xf32>
    %13 = tpu.matmul %12, %8, %cst_13 {dimension_numbers = #tpu.dot_dimension_numbers<[1], [0], [0], [1], [0, 0, 1, 1], [], []>} : vector<2x32xbf16>, vector<32x8xbf16>, vector<2x8xf32> -> vector<2x8xf32>
    %c0_14 = arith.constant 0 : index
    %c0_15 = arith.constant 0 : index
    %14 = vector.load %arg6[%c0_14, %c0_15] : memref<32x64xbf16, #tpu.memory_space<vmem>>, vector<32x64xbf16>
    %cst_16 = arith.constant dense<0.000000e+00> : vector<8x64xf32>
    %15 = tpu.matmul %11, %14, %cst_16 {dimension_numbers = #tpu.dot_dimension_numbers<[1], [0], [0], [1], [0, 0, 1, 1], [], []>} : vector<8x32xbf16>, vector<32x64xbf16>, vector<8x64xf32> -> vector<8x64xf32>
    %16 = arith.truncf %15 : vector<8x64xf32> to vector<8x64xbf16>
    %cst_17 = arith.constant 0.000000e+00 : f32
    %17 = vector.broadcast %cst_17 : f32 to vector<8x32xf32>
    %18 = vector.extract_strided_slice %13 {offsets = [0, 0], sizes = [1, 8], strides = [1, 1]} : vector<2x8xf32> to vector<1x8xf32>
    %19 = vector.shape_cast %18 : vector<1x8xf32> to vector<1x1x8xf32>
    %cst_18 = arith.constant dense<0xFF800000> : vector<1xf32>
    %20 = vector.multi_reduction <maximumf>, %19, %cst_18 [1, 2] : vector<1x1x8xf32> to vector<1xf32>
    %21 = vector.shape_cast %20 : vector<1xf32> to vector<1x1x1xf32>
    %22 = vector.extract %21[0, 0, 0] : f32 from vector<1x1x1xf32>
    %23 = vector.broadcast %22 : f32 to vector<1x8xf32>
    %24 = arith.subf %18, %23 : vector<1x8xf32>
    %25 = math.exp %24 : vector<1x8xf32>
    %cst_19 = arith.constant 0.000000e+00 : f32
    %26 = vector.broadcast %cst_19 : f32 to vector<8x8xf32>
    %27 = vector.shape_cast %25 : vector<1x8xf32> to vector<1x8xf32>
    %28 = vector.broadcast %27 : vector<1x8xf32> to vector<8x8xf32>
    %29 = arith.select %5, %26, %28 : vector<8x8xi1>, vector<8x8xf32>
    %cst_20 = arith.constant dense<0.000000e+00> : vector<8xf32>
    %30 = vector.multi_reduction <add>, %29, %cst_20 [1] : vector<8x8xf32> to vector<8xf32>
    %31 = vector.shape_cast %30 : vector<8xf32> to vector<8x1xf32>
    %cst_21 = arith.constant 0.000000e+00 : f32
    %32 = vector.broadcast %cst_21 : f32 to vector<8x1xf32>
    %33 = arith.cmpf ogt, %31, %32 : vector<8x1xf32>
    %34 = tpu.reciprocal %31 {approx = true} : vector<8x1xf32> -> vector<8x1xf32>
    %35 = vector.broadcast %34 : vector<8x1xf32> to vector<8x8xf32>
    %36 = arith.mulf %29, %35 : vector<8x8xf32>
    %cst_22 = arith.constant 1.250000e-01 : f32
    %37 = vector.shape_cast %33 : vector<8x1xi1> to vector<8x1xi1>
    %38 = vector.broadcast %37 : vector<8x1xi1> to vector<8x8xi1>
    %39 = vector.broadcast %cst_22 : f32 to vector<8x8xf32>
    %40 = arith.select %38, %36, %39 : vector<8x8xi1>, vector<8x8xf32>
    %c0_23 = arith.constant 0 : index
    %c0_24 = arith.constant 0 : index
    %c0_25 = arith.constant 0 : index
    %c0_26 = arith.constant 0 : index
    %41 = vector.load %arg11[%c0_23, %c0_24, %c0_25, %c0_26] : memref<2x1x8x8xf32, #tpu.memory_space<vmem>>, vector<1x1x8x8xf32>
    %42 = vector.shape_cast %41 : vector<1x1x8x8xf32> to vector<8x8xf32>
    %43 = vector.shape_cast %40 : vector<8x8xf32> to vector<1x1x8x8xf32>
    tpu.vector_store %arg11[%c0_23, %c0_24, %c0_25, %c0_26], %43 {strides = array<i32>} : memref<2x1x8x8xf32, #tpu.memory_space<vmem>>, vector<1x1x8x8xf32>,
    %44 = arith.truncf %40 : vector<8x8xf32> to vector<8x8xbf16>
    %45 = vector.extract_strided_slice %16 {offsets = [0, 0], sizes = [8, 32], strides = [1, 1]} : vector<8x64xbf16> to vector<8x32xbf16>
    %cst_27 = arith.constant dense<0.000000e+00> : vector<8x32xf32>
    %46 = tpu.matmul %44, %45, %cst_27 {dimension_numbers = #tpu.dot_dimension_numbers<[1], [0], [0], [1], [0, 0, 1, 1], [], []>} : vector<8x8xbf16>, vector<8x32xbf16>, vector<8x32xf32> -> vector<8x32xf32>
    %47 = arith.addf %17, %46 : vector<8x32xf32>
    %48 = vector.extract_strided_slice %13 {offsets = [1, 0], sizes = [1, 8], strides = [1, 1]} : vector<2x8xf32> to vector<1x8xf32>
    %49 = vector.shape_cast %48 : vector<1x8xf32> to vector<1x1x8xf32>
    %cst_28 = arith.constant dense<0xFF800000> : vector<1xf32>
    %50 = vector.multi_reduction <maximumf>, %49, %cst_28 [1, 2] : vector<1x1x8xf32> to vector<1xf32>
    %51 = vector.shape_cast %50 : vector<1xf32> to vector<1x1x1xf32>
    %52 = vector.extract %51[0, 0, 0] : f32 from vector<1x1x1xf32>
    %53 = vector.broadcast %52 : f32 to vector<1x8xf32>
    %54 = arith.subf %48, %53 : vector<1x8xf32>
    %55 = math.exp %54 : vector<1x8xf32>
    %cst_29 = arith.constant 0.000000e+00 : f32
    %56 = vector.broadcast %cst_29 : f32 to vector<8x8xf32>
    %57 = vector.shape_cast %55 : vector<1x8xf32> to vector<1x8xf32>
    %58 = vector.broadcast %57 : vector<1x8xf32> to vector<8x8xf32>
    %59 = arith.select %5, %56, %58 : vector<8x8xi1>, vector<8x8xf32>
    %cst_30 = arith.constant dense<0.000000e+00> : vector<8xf32>
    %60 = vector.multi_reduction <add>, %59, %cst_30 [1] : vector<8x8xf32> to vector<8xf32>
    %61 = vector.shape_cast %60 : vector<8xf32> to vector<8x1xf32>
    %cst_31 = arith.constant 0.000000e+00 : f32
    %62 = vector.broadcast %cst_31 : f32 to vector<8x1xf32>
    %63 = arith.cmpf ogt, %61, %62 : vector<8x1xf32>
    %64 = tpu.reciprocal %61 {approx = true} : vector<8x1xf32> -> vector<8x1xf32>
    %65 = vector.broadcast %64 : vector<8x1xf32> to vector<8x8xf32>
    %66 = arith.mulf %59, %65 : vector<8x8xf32>
    %cst_32 = arith.constant 1.250000e-01 : f32
    %67 = vector.shape_cast %63 : vector<8x1xi1> to vector<8x1xi1>
    %68 = vector.broadcast %67 : vector<8x1xi1> to vector<8x8xi1>
    %69 = vector.broadcast %cst_32 : f32 to vector<8x8xf32>
    %70 = arith.select %68, %66, %69 : vector<8x8xi1>, vector<8x8xf32>
    %c1 = arith.constant 1 : index
    %c0_33 = arith.constant 0 : index
    %c0_34 = arith.constant 0 : index
    %c0_35 = arith.constant 0 : index
    %71 = vector.load %arg11[%c1, %c0_33, %c0_34, %c0_35] : memref<2x1x8x8xf32, #tpu.memory_space<vmem>>, vector<1x1x8x8xf32>
    %72 = vector.shape_cast %71 : vector<1x1x8x8xf32> to vector<8x8xf32>
    %73 = vector.shape_cast %70 : vector<8x8xf32> to vector<1x1x8x8xf32>
    tpu.vector_store %arg11[%c1, %c0_33, %c0_34, %c0_35], %73 {strides = array<i32>} : memref<2x1x8x8xf32, #tpu.memory_space<vmem>>, vector<1x1x8x8xf32>,
    %74 = arith.truncf %70 : vector<8x8xf32> to vector<8x8xbf16>
    %75 = vector.extract_strided_slice %16 {offsets = [0, 32], sizes = [8, 32], strides = [1, 1]} : vector<8x64xbf16> to vector<8x32xbf16>
    %cst_36 = arith.constant dense<0.000000e+00> : vector<8x32xf32>
    %76 = tpu.matmul %74, %75, %cst_36 {dimension_numbers = #tpu.dot_dimension_numbers<[1], [0], [0], [1], [0, 0, 1, 1], [], []>} : vector<8x8xbf16>, vector<8x32xbf16>, vector<8x32xf32> -> vector<8x32xf32>
    %77 = arith.addf %47, %76 : vector<8x32xf32>
    %c0_37 = arith.constant 0 : index
    %c0_38 = arith.constant 0 : index
    %78 = vector.load %arg7[%c0_37, %c0_38] : memref<1x32xf32, #tpu.memory_space<vmem>>, vector<1x32xf32>
    %79 = vector.broadcast %78 : vector<1x32xf32> to vector<8x32xf32>
    %80 = arith.addf %77, %79 : vector<8x32xf32>
    %cst_39 = arith.constant 0.000000e+00 : f32
    %81 = vector.broadcast %cst_39 : f32 to vector<8x32xf32>
    %82 = arith.cmpf oge, %80, %81 : vector<8x32xf32>
    %cst_40 = arith.constant 2.000000e-01 : f32
    %83 = vector.broadcast %cst_40 : f32 to vector<8x32xf32>
    %84 = arith.mulf %83, %80 : vector<8x32xf32>
    %85 = arith.select %82, %80, %84 : vector<8x32xi1>, vector<8x32xf32>
    %86 = arith.addf %85, %1 : vector<8x32xf32>
    %cst_41 = arith.constant dense<0.000000e+00> : vector<8xf32>
    %87 = vector.multi_reduction <add>, %86, %cst_41 [1] : vector<8x32xf32> to vector<8xf32>
    %88 = vector.shape_cast %87 : vector<8xf32> to vector<8x1xf32>
    %cst_42 = arith.constant 3.200000e+01 : f32
    %89 = vector.broadcast %cst_42 : f32 to vector<8x1xf32>
    %90 = arith.divf %88, %89 : vector<8x1xf32>
    %91 = vector.broadcast %90 : vector<8x1xf32> to vector<8x32xf32>
    %92 = arith.subf %86, %91 : vector<8x32xf32>
    %93 = arith.mulf %92, %92 : vector<8x32xf32>
    %cst_43 = arith.constant dense<0.000000e+00> : vector<8xf32>
    %94 = vector.multi_reduction <add>, %93, %cst_43 [1] : vector<8x32xf32> to vector<8xf32>
    %95 = vector.shape_cast %94 : vector<8xf32> to vector<8x1xf32>
    %cst_44 = arith.constant 3.200000e+01 : f32
    %96 = vector.broadcast %cst_44 : f32 to vector<8x1xf32>
    %97 = arith.divf %95, %96 : vector<8x1xf32>
    %98 = vector.broadcast %90 : vector<8x1xf32> to vector<8x32xf32>
    %99 = arith.subf %86, %98 : vector<8x32xf32>
    %cst_45 = arith.constant 9.99999974E-6 : f32
    %100 = vector.broadcast %cst_45 : f32 to vector<8x1xf32>
    %101 = arith.addf %97, %100 : vector<8x1xf32>
    %102 = math.rsqrt %101 : vector<8x1xf32>
    %103 = vector.broadcast %102 : vector<8x1xf32> to vector<8x32xf32>
    %104 = arith.mulf %99, %103 : vector<8x32xf32>
    %c0_46 = arith.constant 0 : index
    %c0_47 = arith.constant 0 : index
    %105 = vector.load %arg8[%c0_46, %c0_47] : memref<1x32xf32, #tpu.memory_space<vmem>>, vector<1x32xf32>
    %106 = vector.broadcast %105 : vector<1x32xf32> to vector<8x32xf32>
    %107 = arith.mulf %104, %106 : vector<8x32xf32>
    %c0_48 = arith.constant 0 : index
    %c0_49 = arith.constant 0 : index
    %108 = vector.load %arg9[%c0_48, %c0_49] : memref<1x32xf32, #tpu.memory_space<vmem>>, vector<1x32xf32>
    %109 = vector.broadcast %108 : vector<1x32xf32> to vector<8x32xf32>
    %110 = arith.addf %107, %109 : vector<8x32xf32>
    %c0_50 = arith.constant 0 : index
    %c0_51 = arith.constant 0 : index
    %c0_52 = arith.constant 0 : index
    %111 = vector.load %arg10[%c0_50, %c0_51, %c0_52] : memref<1x8x32xf32, #tpu.memory_space<vmem>>, vector<1x8x32xf32>
    %112 = vector.shape_cast %111 : vector<1x8x32xf32> to vector<8x32xf32>
    %113 = vector.shape_cast %110 : vector<8x32xf32> to vector<1x8x32xf32>
    tpu.vector_store %arg10[%c0_50, %c0_51, %c0_52], %113 {strides = array<i32>} : memref<1x8x32xf32, #tpu.memory_space<vmem>>, vector<1x8x32xf32>,
    return
  }
  func.func @transform_0(%arg0: i32) -> (i32, i32, i32) {
    %c0_i32 = arith.constant 0 : i32
    %c0_i32_0 = arith.constant 0 : i32
    %c0_i32_1 = arith.constant 0 : i32
    return %arg0, %c0_i32, %c0_i32_0 : i32, i32, i32
  }
  func.func @transform_1(%arg0: i32) -> (i32, i32, i32) {
    %c0_i32 = arith.constant 0 : i32
    %c0_i32_0 = arith.constant 0 : i32
    %c0_i32_1 = arith.constant 0 : i32
    return %arg0, %c0_i32, %c0_i32_0 : i32, i32, i32
  }
  func.func @transform_2(%arg0: i32) -> (i32, i32, i32) {
    %c0_i32 = arith.constant 0 : i32
    %c0_i32_0 = arith.constant 0 : i32
    %c0_i32_1 = arith.constant 0 : i32
    return %arg0, %c0_i32, %c0_i32_0 : i32, i32, i32
  }
  func.func @transform_3(%arg0: i32) -> (i32, i32, i32) {
    %c0_i32 = arith.constant 0 : i32
    %c0_i32_0 = arith.constant 0 : i32
    %c0_i32_1 = arith.constant 0 : i32
    return %arg0, %c0_i32, %c0_i32_0 : i32, i32, i32
  }
  func.func @transform_4(%arg0: i32) -> (i32, i32) {
    %c0_i32 = arith.constant 0 : i32
    %c0_i32_0 = arith.constant 0 : i32
    %c0_i32_1 = arith.constant 0 : i32
    return %c0_i32, %c0_i32_0 : i32, i32
  }
  func.func @transform_5(%arg0: i32) -> (i32, i32) {
    %c0_i32 = arith.constant 0 : i32
    %c0_i32_0 = arith.constant 0 : i32
    %c0_i32_1 = arith.constant 0 : i32
    return %c0_i32, %c0_i32_0 : i32, i32
  }
  func.func @transform_6(%arg0: i32) -> (i32, i32) {
    %c0_i32 = arith.constant 0 : i32
    %c0_i32_0 = arith.constant 0 : i32
    %c0_i32_1 = arith.constant 0 : i32
    return %c0_i32, %c0_i32_0 : i32, i32
  }
  func.func @transform_7(%arg0: i32) -> (i32, i32) {
    %c0_i32 = arith.constant 0 : i32
    %c0_i32_0 = arith.constant 0 : i32
    %c0_i32_1 = arith.constant 0 : i32
    return %c0_i32, %c0_i32_0 : i32, i32
  }
  func.func @transform_8(%arg0: i32) -> (i32, i32) {
    %c0_i32 = arith.constant 0 : i32
    %c0_i32_0 = arith.constant 0 : i32
    %c0_i32_1 = arith.constant 0 : i32
    return %c0_i32, %c0_i32_0 : i32, i32
  }
  func.func @transform_9(%arg0: i32) -> (i32, i32, i32) {
    %c0_i32 = arith.constant 0 : i32
    %c0_i32_0 = arith.constant 0 : i32
    %c0_i32_1 = arith.constant 0 : i32
    return %arg0, %c0_i32, %c0_i32_0 : i32, i32, i32
  }
  func.func @transform_10(%arg0: i32) -> (i32, i32, i32, i32) {
    %c0_i32 = arith.constant 0 : i32
    %c0_i32_0 = arith.constant 0 : i32
    %c0_i32_1 = arith.constant 0 : i32
    %c0_i32_2 = arith.constant 0 : i32
    return %c0_i32, %arg0, %c0_i32_0, %c0_i32_1 : i32, i32, i32, i32
  }
}

</mosaic_0001>

<bundles_post_ra>
// kernel: tpu_custom_call.1
= control target key start
LH: loop header
LB: loop body
LE: loop exit
PB: predicated region body
PF: predicated region fallthrough
CT: control target
= control target key end

     0   :  { %s1386_s0 = inlined_call_operand.vmem [shape: f32[2,8,32], index: 0, kind: input, shape index: {}]   ;;  %s1387_s1 = inlined_call_operand.vmem [shape: f32[2,32,8], index: 1, kind: input, shape index: {}]   ;;  %s1388_s2 = inlined_call_operand.vmem [shape: f32[2,8,32], index: 2, kind: input, shape index: {}]   ;;  %s1389_s3 = inlined_call_operand.vmem [shape: f32[2,8,8], index: 3, kind: input, shape index: {}]   ;;  %s1390_s4 = inlined_call_operand.vmem [shape: bf16[2,32], index: 4, kind: input, shape index: {}]   ;;  %s1391_s5 = inlined_call_operand.vmem [shape: bf16[32,64], index: 5, kind: input, shape index: {}]   ;;  %s1392_s6 = inlined_call_operand.vmem [shape: f32[1,32], index: 6, kind: input, shape index: {}]   ;;  %s1393_s7 = inlined_call_operand.vmem [shape: f32[1,32], index: 7, kind: input, shape index: {}]   ;;  %s1394_s8 = inlined_call_operand.vmem [shape: f32[1,32], index: 8, kind: input, shape index: {}]   ;;  %s1395_s9 = inlined_call_operand.hbm [shape: f32[2,8,32], index: 9, kind: output, shape index: {0}]   ;;  %s1396_s10 = inlined_call_operand.hbm [shape: f32[2,2,8,8], index: 10, kind: output, shape index: {1}]  }
   0x1   :  { %1398 = sst [smem:[#allocation8_spill]] %s1386_s0 }
   0x2   :  { %1399 = sst [smem:[#allocation9_spill]] %s1387_s1 }
   0x3   :  { %1400 = sst [smem:[#allocation10_spill]] %s1388_s2 }
   0x4   :  { %16 = vsyncpa [#allocation3], 0 }
   0x5   :  { %18 = vsyncpa [#allocation3 + $0x1], 0 }
   0x6   :  { %19 = vsyncpa [#allocation5], 0 }
   0x7   :  { %21 = vsyncpa [#allocation5 + $0x1], 0  ;;  %s1192_s13 = smov 0   ;;  %s1194_s14 = smov 0  }
   0x8   :  { %s1196_s15 = smov 0   ;;  %s1198_s16 = smov 0  }
   0x9 LB: > { %s1213_s17 = sadd.s32 4294967295, %s1127_s16   ;;  %s901_s18 = sadd.s32 4294967294, %s1127_s16   ;;  %s1127_s16 = sphi %s1198_s16, %s1411_s16   ;;  %s1123_s15 = sphi %s1196_s15, %s1410_s15   ;;  %s1119_s14 = sphi %s1194_s14, %s1409_s14   ;;  %s1115_s13 = sphi %s1192_s13, %s1408_s13  }
   0xa   : > { %s1217_s19 = sadd.s32 1, %s1127_s16   ;;  %s243_s20 = sadd.s32 1, %s1123_s15 }
   0xb   : > { %s240_s21 = ssub.s32 %s1127_s16, %s1217_s19  ;;  %p253_p0 = scmp.ne.s32.totalorder %s1123_s15, %s1119_s14 }
   0xc   : > { %p241_p1 = scmp.eq.s32.totalorder %s240_s21, 0  ;;  %p254_p2 = scmp.eq.s32.totalorder %s1213_s17, 1 }
   0xd   : > { %p259_p3 = scmp.ne.s32.totalorder %s1119_s14, %s1115_s13  ;;  %p260_p4 = scmp.eq.s32.totalorder %s901_s18, 1 }
   0xe   : > { %s1228_s22 = scalar_select %p241_p1, %s1123_s15, %s243_s20  }
   0xf   : > { %p1230_p5 = por %p254_p2, %p253_p0  ;;  %p1234_p6 = por %p260_p4, %p259_p3 }
  0x10   : > { %p904_p7 = scmp.ge.s32.totalorder %s1127_s16, 1  ;;  %p348_p8 = scmp.lt.s32.totalorder %s1127_s16, 3 }
  0x12   : > { %p349_p9 = pnand %p904_p7, %p348_p8 }
  0x13   : > { %p403_p10 = scmp.lt.s32.totalorder (!%p349_p9), %s1213_s17, 1  ;;  %v1129_v0 = vmov (!%p349_p9), 0.0   ;;  %vm1130_vm0 = vmmov (!%p349_p9), 0   ;;  %s1403_s1 = sld [smem:[#allocation9_spill]] (!%p349_p9)  ;;  %v432_v7 = vld [vmem:[%s1390_s4] sm:$0x1] (!%p349_p9)  ;;  %v552_v42 = vlaneseq (!%p349_p9) }
  0x14   : > { %352 = sbr.rel (%p349_p9) target bundleno = 1188 (0x4a4), region = 56  ;;  %939 = vmatprep.subr.bf16.mxu0 (!%p349_p9), %v1129_v0  ;;  %943 = vmatprep.mubr.msk.bf16.mxu0 (!%p349_p9), %vm1130_vm0, %v1129_v0  ;;  %vm433_vm1 = vcmask (!%p349_p9), 261120   ;;  %v1021_v8 = vld [vmem:[%s1391_s5] sm:$0xff] (!%p349_p9)   ;;  %s1404_s2 = sld [smem:[#allocation10_spill]] (!%p349_p9)  ;;  %v1022_v9 = vld [vmem:[%s1391_s5 + $0x8] sm:$0xff] (!%p349_p9)   ;;  %vm537_vm2 = vcmask (!%p349_p9), 57344  }
  0x15   : > { %947 = vmatprep.subr.bf16.mxu1 (!%p349_p9), %v1129_v0  ;;  %951 = vmatprep.mubr.msk.bf16.mxu1 (!%p349_p9), %vm1130_vm0, %v1129_v0  ;;  %vm569_vm3 = vcmask (!%p349_p9), 58369   ;;  %vm607_vm4 = vcmask (!%p349_p9), 1043456   ;;  %v553_v45 = vshrl.u32 (!%p349_p9), %v552_v42, 7  ;;  %vm557_vm6 = vcmask (!%p349_p9), 64512   ;;  %s1405_s0 = sld [smem:[#allocation8_spill]] (!%p349_p9)  ;;  %s1397_s18 = sshll.u32 (!%p349_p9), %s1213_s17, 7 }
  0x16   : > { %948 = vmatpush3.bf16.msra.mxu1 (!%p349_p9), %v1021_v8 }
  0x17   : > { %949 = vmatprep.subr.bf16.mxu1 (!%p349_p9), %v1129_v0  ;;  %v554_v47 = vsub.s32 (!%p349_p9), 0, %v553_v45  ;;  %v586_v50 = vsub.s32 (!%p349_p9), 1, %v553_v45 }
  0x1a   : > { %950 = vmatpush3.bf16.msra.mxu1 (!%p349_p9), %v1022_v9 }
  0x1b   : > { %s404_s25 = scalar_select %p403_p10, %s1213_s17, 1  ;;  %961 = vmatprep.subr.bf16.mxu1 %v1129_v0 }
  0x1d   : > { %s928_s26 = sshll.u32 %s404_s25, 5  ;;  %s1255_s20 = sshll.u32 %s404_s25, 3 }
  0x1e   : > { %s411_s29 = scalar_lea.vmem %s1403_s1, %s928_s26  ;;  %s415_s27 = scalar_lea.vmem %s1404_s2, %s1255_s20 }
  0x1f   : > { %v424_v1 = vld [vmem:[%s411_s29] sm:$0xff]  ;;  %v425_v2 = vld [vmem:[%s411_s29 + $0x8] sm:$0xff]  ;;  %v426_v3 = vld [vmem:[%s411_s29 + $0x10] sm:$0xff]  ;;  %s1131_s25 = smov 96   ;;  %s419_s21 = scalar_lea.vmem %s1389_s3, %s1255_s20 }
  0x20   : > { %v428_v4 = vpack.c.bf16 %v425_v2, %v424_v1  ;;  %v427_v5 = vld [vmem:[%s411_s29 + $0x18] sm:$0xff]  ;;  %v430_v10 = vld [vmem:[%s415_s27] sm:$0xff]  ;;  %s1275_s26 = sand.u32 1, %s1119_s14   ;;  %s406_s12 = scalar_lea.vmem %s1405_s0, %s1255_s20 }
  0x21   : > { %v429_v6 = vpack.c.bf16 %v427_v5, %v426_v3  ;;  %v431_v11 = vpack.c.bf16 %v430_v10, %v430_v10  ;;  %v422_v46 = vld [vmem:[%s419_s21] sm:$0xff]  ;;  %s906_s27 = sshll.u32 %s1275_s26, 4  ;;  %s1304_s29 = scalar_lea.hbm %s1396_s10, %s1397_s18 }
  0x22   : > { %940 = vmatpush3.bf16.msra.mxu0 %v428_v4  ;;  %vm423_vm5 = vcmp.gt.f32.partialorder %v422_v46, 0.0  ;;  %s1278_s28 = scalar_lea.vmem [#allocation4], %s906_s27  ;;  %v919_v10 = vld [vmem:[%s1392_s6] ss:$0 sm:$0xff] }
  0x23   : > { %941 = vmatprep.subr.bf16.mxu0 %v1129_v0  ;;  %952 = vmatmul.mubr.msk.bf16.vlgmr.msra.gmra.mrb[0].mxu1 %vm433_vm1, %v431_v11  ;;  %s771_s20 = sshll.u32 %s1278_s28, 4  ;;  %s1297_s20 = int_to_ptr.vmem [resolvable:$true] %s771_s20 }
  0x24   : > { %963 = vmatprep.mubr.msk.bf16.mxu1 %vm1130_vm0, %v1129_v0 }
  0x26   : > { %942 = vmatpush3.bf16.msra.mxu0 %v429_v6 }
  0x27   : > { %955 = vmatprep.subr.bf16.mxu0 %v1129_v0 }
  0x29   : > { %944 = vmatmul.mubr.msk.bf16.vlgmr.msra.gmra.mrb[0].mxu0 %vm433_vm1, %v432_v7 }
  0x2a   : > { %957 = vmatprep.mubr.msk.bf16.mxu0 %vm1130_vm0, %v1129_v0 }
  0xf6   : > { %v530_v18 = vpop.f32.mrb[0].mxu1 }
  0xf7   : > { %v536_v19 = vpack.c.bf16 %v530_v18, %v530_v18  ;;  %v953_v20 = vpop.f32.mrb[1].mxu1 }
  0xf8   : > { %v533_v21 = vpop.f32.mrb[2].mxu1 }
  0xf9   : > { %v655_v22 = vsel %vm607_vm4, %v536_v19, 0  ;;  %v954_v23 = vpop.f32.mrb[3].mxu1 }
  0xfa   : > { %962 = vmatpush3.bf16.msra.mxu1 %v655_v22 }
  0xfc   : > { %v471_v12 = vpop.f32.mrb[0].mxu0 }
  0xfd   : > { %v945_v13 = vpop.f32.mrb[1].mxu0  ;;  %v538_v14 = vsel %vm537_vm2, %v471_v12, -inf  ;;  %v570_v17 = vsel %vm569_vm3, %v471_v12, -inf }
  0xfe   : > { %539 = vmax.xlane.f32.xlu0 %v538_v14  ;;  %v474_v15 = vpop.f32.mrb[2].mxu0 }
  0xff   : > { %v946_v16 = vpop.f32.mrb[3].mxu0 }
 0x102   : > { %571 = vmax.xlane.f32.xlu0 %v570_v17  ;;  %v421_v17 = vld [vmem:[%s406_s12] sm:$0xff] }
 0x118   : > { %602 = vrot.lane.b32.xlu0 %v536_v19, %s1131_s25 }
 0x18b   : > { %v540_v24 = vpop.xlane.xlu0 %539 }
 0x18c   : > { %v541_v25 = vrot.slane %v540_v24, 4 }
 0x18e   : > { %v542_v26 = vmax.f32 %v540_v24, %v541_v25 }
 0x18f   : > { %v572_v27 = vpop.xlane.xlu0 %571 }
 0x190   : > { %v543_v28 = vrot.slane %v542_v26, 2  ;;  %v573_v29 = vrot.slane %v572_v27, 4 }
 0x192   : > { %v574_v30 = vmax.f32 %v572_v27, %v573_v29  ;;  %v544_v31 = vmax.f32 %v542_v26, %v543_v28 }
 0x193   : > { %v603_v57 = vpop.permute.xlu0 %602 }
 0x194   : > { %v575_v32 = vrot.slane %v574_v30, 2  ;;  %v545_v33 = vrot.slane %v544_v31, 1  ;;  %v609_v58 = vsel %vm607_vm4, %v603_v57, 0 }
 0x195   : > { %956 = vmatpush3.bf16.msra.mxu0 %v609_v58 }
 0x196   : > { %v546_v34 = vmax.f32 %v544_v31, %v545_v33  ;;  %v576_v35 = vmax.f32 %v574_v30, %v575_v32 }
 0x198   : > { %967 = vpush %v546_v34  ;;  %v577_v36 = vrot.slane %v576_v35, 1 }
 0x19a   : > { %v578_v37 = vmax.f32 %v576_v35, %v577_v36 }
 0x19c   : > { %969 = vpush %v578_v37 }
 0x1c9   : > { %s968_s30 = spop %967 }
 0x1ca   : > { %v548_v38 = vstv %s968_s30  ;;  %s1033_s30 = scalar_lea.vmem %s1297_s20, 256 }
 0x1cb   : > { %v549_v39 = vsub.f32 %v471_v12, %v548_v38  ;;  %p1034_p11 = scmp.ne.s32.totalorder %s1297_s20, %s1033_s30 }
 0x1cd   : > { %v550_v40 = vmul.f32 1.442695, %v549_v39  ;;  %s970_s11 = spop %969  ;;  %p1035_p12 = pnand %p1034_p11, %p1230_p5 }
 0x1ce   : > { %v580_v41 = vstv %s970_s11  ;;  %s1132_s11 = smov [#allocation4]  }
 0x1cf   : > { %1023 = vpow2.f32 %v550_v40  ;;  %v581_v43 = vsub.f32 %v471_v12, %v580_v41  ;;  %p1036_p13 = pneg %p1035_p12 }
 0x1d1   : > { %v582_v44 = vmul.f32 1.442695, %v581_v43 }
 0x1d3   : > { %1025 = vpow2.f32 %v582_v44 }
 0x1d9   : > { %v1024_v48 = vpop.eup %1023 }
 0x1da   : > { %v555_v49 = vrot.slane %v1024_v48, %v554_v47 }
 0x1dc   : > { %v556_v51 = vsel %vm423_vm5, 0.0, %v555_v49 }
 0x1dd   : > { %v1026_v52 = vpop.eup %1025  ;;  %v558_v53 = vsel %vm557_vm6, %v556_v51, 0.0 }
 0x1de   : > { %559 = vadd.xlane.f32.xlu1 %v558_v53  ;;  %v587_v54 = vrot.slane %v1026_v52, %v586_v50 }
 0x1e0   : > { %v588_v55 = vsel %vm423_vm5, 0.0, %v587_v54 }
 0x1e1   : > { %v589_v56 = vsel %vm557_vm6, %v588_v55, 0.0 }
 0x1e2   : > { %590 = vadd.xlane.f32.xlu1 %v589_v56 }
 0x26b   : > { %v560_v59 = vpop.xlane.xlu1 %559 }
 0x26c   : > { %1027 = vrcp.f32 %v560_v59  ;;  %vm561_vm7 = vcmp.gt.f32.partialorder %v560_v59, 0.0 }
 0x26f   : > { %v591_v60 = vpop.xlane.xlu1 %590 }
 0x270   : > { %1029 = vrcp.f32 %v591_v60  ;;  %vm592_vm8 = vcmp.gt.f32.partialorder %v591_v60, 0.0 }
 0x276   : > { %v1028_v61 = vpop.eup %1027 }
 0x277   : > { %v563_v62 = vmul.f32 %v1028_v61, %v556_v51 }
 0x279   : > { %v566_v63 = vsel %vm561_vm7, %v563_v62, 0.125 }
 0x27a   : > { %v1030_v0 = vpop.eup %1029  ;;  %567 = vst.msk [vmem:[%s1278_s28] sm:$0xff] %vm557_vm6, %v566_v63  ;;  %v568_v1 = vpack.c.bf16 %v566_v63, %v566_v63 }
 0x27b   : > { %v594_v2 = vmul.f32 %v1030_v0, %v588_v55 }
 0x27c   : > { %964 = vmatmul.mubr.msk.bf16.vlgmr.msra.gmra.mrb[4].mxu1 %vm557_vm6, %v568_v1 }
 0x27d   : > { %v597_v3 = vsel %vm592_vm8, %v594_v2, 0.125 }
 0x27e   : > { %916 = vst.msk [vmem:[%s1278_s28 + $0x8] sm:$0xff] %vm557_vm6, %v597_v3  ;;  %v600_v4 = vpack.c.bf16 %v597_v3, %v597_v3  ;;  %s1037_s28 = sshll.u32 %s1132_s11, 4  ;;  %s1038_s28 = int_to_ptr.vmem [resolvable:$false] %s1037_s28 }
 0x27f   : > { %s1039_s12 = scalar_lea.vmem %s1038_s28, 512  ;;  %p1040_p0 = scmp.lt.s32.totalorder %s1297_s20, %s1038_s28 }
 0x280   : > { %958 = vmatmul.mubr.msk.bf16.vlgmr.msra.gmra.mrb[4].mxu0 %vm557_vm6, %v600_v4  ;;  %p1041_p1 = scmp.lt.s32.totalorder %s1039_s12, %s1033_s30 }
 0x282   : > { %p1042_p2 = por %p1041_p1, %p1040_p0 }
 0x284   : > { %p1043_p3 = pnand %p1042_p2, %p1036_p13 }
 0x34f   : > { %v691_v5 = vpop.f32.mrb[4].mxu1 }
 0x350   : > { %v965_v6 = vpop.f32.mrb[5].mxu1 }
 0x351   : > { %v694_v7 = vpop.f32.mrb[6].mxu1 }
 0x352   : > { %v966_v8 = vpop.f32.mrb[7].mxu1 }
 0x353   : > { %v645_v9 = vpop.f32.mrb[4].mxu0 }
 0x354   : > { %v692_v11 = vadd.f32 %v691_v5, %v645_v9  ;;  %v959_v12 = vpop.f32.mrb[5].mxu0 }
 0x355   : > { %v648_v13 = vpop.f32.mrb[6].mxu0 }
 0x356   : > { %v704_v14 = vadd.f32 %v919_v10, %v692_v11  ;;  %v960_v15 = vpop.f32.mrb[7].mxu0 }
 0x358   : > { %v706_v16 = vmul.f32 0.2, %v704_v14  ;;  %vm705_vm9 = vcmp.ge.f32.partialorder %v704_v14, 0.0 }
 0x35a   : > { %v707_v18 = vsel %vm705_vm9, %v704_v14, %v706_v16 }
 0x35b   : > { %v708_v19 = vadd.f32 %v707_v18, %v421_v17 }
 0x35d   : > { %v709_v20 = vsel %vm433_vm1, %v708_v19, 0.0 }
 0x35e   : > { %710 = vadd.xlane.f32.xlu1 %v709_v20 }
 0x3eb   : > { %v711_v21 = vpop.xlane.xlu1 %710 }
 0x3ec   : > { %v713_v22 = vmul.f32 0.03125, %v711_v21 }
 0x3ee   : > { %v714_v23 = vsub.f32 %v708_v19, %v713_v22 }
 0x3f0   : > { %v715_v24 = vmul.f32 %v714_v23, %v714_v23 }
 0x3f2   : > { %v716_v25 = vsel %vm433_vm1, %v715_v24, 0.0 }
 0x3f3   : > { %717 = vadd.xlane.f32.xlu1 %v716_v25 }
 0x3f4   : > { %1046 = shalt.err (!%p1043_p3)
}
 0x3f5   : > { %s1047_s21 = scalar_lea.hbm %s1304_s29, 256  ;;  %s1051_s11 = scalar_lea.hbm %s1396_s10, 512 }
 0x3f6   : > { %p1048_p4 = scmp.ne.s32.totalorder %s1304_s29, %s1047_s21  ;;  %p1052_p9 = scmp.lt.u32.totalorder %s1304_s29, %s1396_s10 }
 0x3f7   : > { %p1053_p10 = scmp.lt.u32.totalorder %s1051_s11, %s1047_s21  ;;  %p1055_p12 = scmp.lt.u32.totalorder %s1047_s21, %s1304_s29 }
 0x3f8   : > { %p1049_p7 = pnand %p1048_p4, %p1230_p5 }
 0x3f9   : > { %p1054_p11 = por %p1053_p10, %p1052_p9 }
 0x3fa   : > { %p1050_p8 = pneg %p1049_p7 }
 0x3fb   : > { %p1056_p13 = por %p1055_p12, %p1054_p11 }
 0x3fd   : > { %p1057_p0 = pnand %p1056_p13, %p1050_p8 }
 0x3ff   : > { %1060 = shalt.err (!%p1057_p0)
}
 0x400   : > { %s1133_s30 = smov 128   ;;  %s1134_s12 = smov 256   ;;  %v920_v30 = vld [vmem:[%s1393_s7] ss:$0 sm:$0xff] }
 0x401   : > { %s1135_s18 = smov 8   ;;  %s1406_s27 = scalar_lea.sflag [#allocation5], %s1275_s26  ;;  %v921_v32 = vld [vmem:[%s1394_s8] ss:$0 sm:$0xff] }
 0x402   : > { %972 = dma.vmem_to_hbm [thread:$0]  (%p1230_p5), %s1297_s20, 256, %s1304_s29, %s1406_s27, %s1133_s30, %s1134_s12, %s1135_s18  }
 0x403   : > { %s905_s25 = sshll.u32 %s1275_s26, 3  ;;  %s1407_s20 = sshll.u32 %s1213_s17, 7 }
 0x404   : > { %s395_s1 = scalar_lea.vmem [#allocation2], %s905_s25  ;;  %s1342_s12 = scalar_lea.hbm %s1395_s9, %s1407_s20 }
 0x405   : > { %s759_s2 = sshll.u32 %s395_s1, 4  ;;  %s741_s18 = scalar_lea.sflag [#allocation3], %s1275_s26  ;;  %s1344_s2 = int_to_ptr.vmem [resolvable:$true] %s759_s2 }
 0x406   : > { %s1061_s0 = scalar_lea.vmem %s1344_s2, 128  ;;  %s1136_s27 = smov [#allocation2]  }
 0x407   : > { %p1062_p1 = scmp.ne.s32.totalorder %s1344_s2, %s1061_s0  ;;  %s1065_s17 = sshll.u32 %s1136_s27, 4  ;;  %s1066_s17 = int_to_ptr.vmem [resolvable:$false] %s1065_s17 }
 0x408   : > { %s1067_s25 = scalar_lea.vmem %s1066_s17, 256  ;;  %p1068_p4 = scmp.lt.s32.totalorder %s1344_s2, %s1066_s17 }
 0x409   : > { %p1063_p2 = pnand %p1062_p1, %p1230_p5  ;;  %p1069_p7 = scmp.lt.s32.totalorder %s1067_s25, %s1061_s0 }
 0x40b   : > { %p1064_p3 = pneg %p1063_p2  ;;  %p1070_p8 = por %p1069_p7, %p1068_p4 }
 0x40d   : > { %p1071_p9 = pnand %p1070_p8, %p1064_p3 }
 0x480   : > { %v718_v26 = vpop.xlane.xlu1 %717 }
 0x481   : > { %v719_v27 = vmul.f32 0.03125, %v718_v26 }
 0x483   : > { %v720_v28 = vadd.f32 1e-05, %v719_v27 }
 0x485   : > { %1031 = vrsqrt.f32 %v720_v28 }
 0x48f   : > { %v1032_v29 = vpop.eup %1031 }
 0x490   : > { %v722_v31 = vmul.f32 %v1032_v29, %v714_v23 }
 0x492   : > { %v730_v33 = vmul.f32 %v920_v30, %v722_v31 }
 0x494   : > { %v738_v34 = vadd.f32 %v921_v32, %v730_v33 }
 0x496   : > { %739 = vst.msk [vmem:[%s395_s1] sm:$0xff] %vm433_vm1, %v738_v34 }
 0x497   : > { %1074 = shalt.err (!%p1071_p9)
}
 0x498   : > { %s1075_s1 = scalar_lea.hbm %s1342_s12, 128  ;;  %s1079_s11 = scalar_lea.hbm %s1395_s9, 256 }
 0x499   : > { %p1076_p10 = scmp.ne.s32.totalorder %s1342_s12, %s1075_s1  ;;  %p1080_p13 = scmp.lt.u32.totalorder %s1342_s12, %s1395_s9 }
 0x49a   : > { %p1081_p0 = scmp.lt.u32.totalorder %s1079_s11, %s1075_s1  ;;  %p1083_p2 = scmp.lt.u32.totalorder %s1075_s1, %s1342_s12 }
 0x49b   : > { %p1077_p11 = pnand %p1076_p10, %p1230_p5 }
 0x49c   : > { %p1082_p1 = por %p1081_p0, %p1080_p13 }
 0x49d   : > { %p1078_p12 = pneg %p1077_p11 }
 0x49e   : > { %p1084_p3 = por %p1083_p2, %p1082_p1 }
 0x4a0   : > { %p1085_p4 = pnand %p1084_p3, %p1078_p12 }
 0x4a2   : > { %1088 = shalt.err (!%p1085_p4)
}
 0x4a3   : > { %971 = dma.vmem_to_hbm [thread:$0]  (%p1230_p5), %s1344_s2, 128, %s1342_s12, %s741_s18  }
 0x4a4 PF: > { %p982_p7 = scmp.ge.s32.totalorder %s1127_s16, 2  ;;  %s786_s29 = sand.u32 1, %s1115_s13  }
 0x4a5   : > { %s787_s30 = scalar_lea.sflag [#allocation3], %s786_s29 }
 0x4a6   : > { %p976_p8 = pnand %p982_p7, %p1234_p6 }
 0x4a8   : > { %1106 = dma.done.wait (!%p976_p8), %s787_s30, 128  }
 0x4a9   : > { %1108 = vsyncadd (!%p976_p8), %s787_s30, 4294967168  ;;  %s796_s0 = scalar_lea.sflag [#allocation5], %s786_s29 }
 0x4aa   : > { %1110 = dma.done.wait (!%p976_p8), %s796_s0, 256  }
 0x4ab   : > { %1112 = vsyncadd (!%p976_p8), %s796_s0, 4294967040  ;;  %p24_p5 = scmp.ge.s32.totalorder %s1217_s19, 4   ;;  %s1408_s13 = smov %s1119_s14 }
 0x4ac   : > { %s1409_s14 = smov %s1123_s15  ;;  %s1410_s15 = smov %s1228_s22 }
 0x4ad   : > { %s1411_s16 = smov %s1217_s19  ;;  %26 = sbr.rel (!%p24_p5) target bundleno = 9 (0x9), region = 118 }
 0x4b4   :  { %801 = vsyncpa [#allocation3], 1 }
 0x4b5   :  { %803 = vsyncpa [#allocation3 + $0x1], 1 }
 0x4b6   :  { %804 = vsyncpa [#allocation5], 1 }
 0x4b7   :  { %806 = vsyncpa [#allocation5 + $0x1], 1 }

</bundles_post_ra>
